<compile_context>
chip_gen: v6e
topology: v6e:2x2x1
jax: 0.10.0
libtpu: 0.0.40
codegen_flags: <defaults>
</compile_context>

<pallas_src>
import functools

import jax
import jax.numpy as jnp
from jax.experimental import pallas as pl
from jax.experimental.pallas import tpu as pltpu


def _round_up(x, m):
    return ((x + m - 1) // m) * m


def _lsr_ce_kernel(pre_ref, label_ref, out_ref, *, para_lsr, tb, batch):
    i = pl.program_id(0)

    x = pre_ref[...].astype(jnp.float32)            # (TB, C), upcast in-kernel
    rows, c = x.shape

    # --- numerically stable log-sum-exp pieces (per row) ---
    m = jnp.max(x, axis=-1, keepdims=True)          # (TB, 1)
    lse = jnp.log(jnp.sum(jnp.exp(x - m), axis=-1, keepdims=True))  # (TB, 1)

    # --- closed-form label-smoothed loss (no (TB, C) one-hot materialized) ---
    lbl = label_ref[...]                            # (TB, 1) int32
    col = jax.lax.broadcasted_iota(jnp.int32, (rows, c), 1)
    x_at_lbl = jnp.sum(jnp.where(col == lbl, x, 0.0), axis=-1, keepdims=True)
    sum_x = jnp.sum(x, axis=-1, keepdims=True)

    prob = para_lsr / c
    smooth_term = (1.0 - para_lsr) * x_at_lbl + prob * sum_x
    target_term = jnp.where(lbl == 1, x_at_lbl, smooth_term)   # label==1 hard case
    per_ex = (m + lse) - target_term                # (TB, 1)

    # --- mask padded rows of the last (remainder) tile ---
    row = i * tb + jax.lax.broadcasted_iota(jnp.int32, (rows, 1), 0)
    per_ex = jnp.where(row < batch, per_ex, 0.0)

    # per-tile partial sum; final reduce + normalization happen in the wrapper
    out_ref[...] = jnp.full((1, 1, 1), jnp.sum(per_ex), dtype=jnp.float32)


def cross_entropy_lsr(pre, label, para_lsr=0.2, size_average=True, block_rows=None):
    """Pallas implementation of CrossEntropyLoss_LSR.forward."""
    b, c = pre.shape
    label2d = label.reshape(b, 1).astype(jnp.int32)

    itemsize = jnp.dtype(pre.dtype).itemsize
    sub = {4: 8, 2: 16, 1: 32}.get(itemsize, 8)     # sublane packing for the load dtype

    if block_rows is None:
        # largest batch tile whose double-buffered logit blocks stay under ~24 MiB
        # (v7x-safe); capped so huge batches still expose grid parallelism.
        budget = 24 * 1024 * 1024
        tb_cap = max(sub, (budget // (2 * c * itemsize)) // sub * sub)
        tb = min(tb_cap, _round_up(b, sub), 4096)
    else:
        tb = _round_up(block_rows, sub)
    tb = max(tb, sub)
    num_tiles = pl.cdiv(b, tb)

    # explicit scoped-VMEM limit: double-buffered logits + labels + headroom,
    # clamped to <= 64 MiB so the same config is valid on v5e/v6e/v7x.
    vmem_need = 2 * (tb * c * itemsize + tb * 4) + 4 * 1024
    vmem_limit = int(min(64 << 20, max(32 << 20, vmem_need + (8 << 20))))

    kernel = functools.partial(
        _lsr_ce_kernel, para_lsr=float(para_lsr), tb=tb, batch=b
    )

    partials = pl.pallas_call(
        kernel,
        out_shape=jax.ShapeDtypeStruct((num_tiles, 1, 1), jnp.float32),
        grid=(num_tiles,),
        in_specs=[
            pl.BlockSpec((tb, c), lambda i: (i, 0)),   # logits tile (native dtype)
            pl.BlockSpec((tb, 1), lambda i: (i, 0)),   # labels tile
        ],
        out_specs=pl.BlockSpec((1, 1, 1), lambda i: (i, 0, 0)),
        compiler_params=pltpu.CompilerParams(
            dimension_semantics=("parallel",),
            vmem_limit_bytes=vmem_limit,
        ),
    )(pre, label2d)

    total = jnp.sum(partials)
    if size_average:
        total = total / b
    return total


def _reference(pre, label, para_lsr=0.2, size_average=True):
    """Pure-JAX reference mirroring the PyTorch module."""
    b, c = pre.shape
    logp = jax.nn.log_softmax(pre.astype(jnp.float32), axis=-1)
    col = jnp.arange(c)[None, :]
    lbl = label.reshape(b, 1)
    is_lbl = col == lbl
    prob = para_lsr / c
    smooth = jnp.where(is_lbl, prob + (1.0 - para_lsr), prob)
    hard = jnp.where(is_lbl, 1.0, 0.0)
    one_hot = jnp.where(lbl == 1, hard, smooth)
    loss = jnp.sum(-one_hot * logp, axis=-1)
    return jnp.mean(loss) if size_average else jnp.sum(loss)


if __name__ == "__main__":
    key = jax.random.PRNGKey(0)
    k1, k2 = jax.random.split(key)

    # --- small single-tile f32 case (exercises the label == 1 special branch) ---
    B, C = 8, 16
    pre = jax.random.normal(k1, (B, C), dtype=jnp.float32)
    label = jax.random.randint(k2, (B,), 0, C, dtype=jnp.int32)
    label = label.at[0].set(1)

    loss = jax.block_until_ready(cross_entropy_lsr(pre, label, 0.2, True))
    ref = _reference(pre, label, 0.2, True)
    assert jnp.allclose(loss, ref, atol=1e-5, rtol=1e-5), (loss, ref)

    loss_sum = jax.block_until_ready(cross_entropy_lsr(pre, label, 0.2, False))
    ref_sum = _reference(pre, label, 0.2, False)
    assert jnp.allclose(loss_sum, ref_sum, atol=1e-5, rtol=1e-5), (loss_sum, ref_sum)

    # --- multi-tile grid with a masked remainder tile, bf16 logits upcast in-kernel ---
    B2, C2 = 20, 16
    k3, k4 = jax.random.split(k2)
    pre2 = jax.random.normal(k3, (B2, C2), dtype=jnp.bfloat16)
    label2 = jax.random.randint(k4, (B2,), 0, C2, dtype=jnp.int32)
    label2 = label2.at[3].set(1)

    loss2 = jax.block_until_ready(
        cross_entropy_lsr(pre2, label2, 0.2, True, block_rows=8)
    )
    ref2 = _reference(pre2, label2, 0.2, True)
    assert jnp.allclose(loss2, ref2, atol=1e-4, rtol=1e-4), (loss2, ref2)

    print("KERNEL_OK")
</pallas_src>

<mosaic_0001>
module attributes {stable_mosaic.version = 11 : i64} {
  func.func @_lsr_ce_kernel(%arg0: i32, %arg1: memref<8x16xf32, #tpu.memory_space<vmem>>, %arg2: memref<8x1xi32, #tpu.memory_space<vmem>>, %arg3: memref<1x1x1xf32, #tpu.memory_space<vmem>>) attributes {dimension_semantics = [#tpu.dimension_semantics<parallel>], iteration_bounds = array<i64: 1>, scalar_prefetch = 0 : i64, scratch_operands = 0 : i64, tpu.core_type = #tpu.core_type<tc>, window_params = [{transform_indices = @transform_0, window_bounds = array<i64: 8, 16>}, {transform_indices = @transform_1, window_bounds = array<i64: 8, 1>}, {transform_indices = @transform_2, window_bounds = array<i64: 1, 1, 1>}]} {
    %c0 = arith.constant 0 : index
    %c0_0 = arith.constant 0 : index
    %0 = vector.load %arg1[%c0, %c0_0] : memref<8x16xf32, #tpu.memory_space<vmem>>, vector<8x16xf32>
    %cst = arith.constant dense<0xFF800000> : vector<8xf32>
    %1 = vector.multi_reduction <maximumf>, %0, %cst [1] : vector<8x16xf32> to vector<8xf32>
    %2 = vector.shape_cast %1 : vector<8xf32> to vector<8x1xf32>
    %3 = vector.broadcast %2 : vector<8x1xf32> to vector<8x16xf32>
    %4 = arith.subf %0, %3 : vector<8x16xf32>
    %5 = math.exp %4 : vector<8x16xf32>
    %cst_1 = arith.constant dense<0.000000e+00> : vector<8xf32>
    %6 = vector.multi_reduction <add>, %5, %cst_1 [1] : vector<8x16xf32> to vector<8xf32>
    %7 = vector.shape_cast %6 : vector<8xf32> to vector<8x1xf32>
    %8 = math.log %7 : vector<8x1xf32>
    %c0_2 = arith.constant 0 : index
    %c0_3 = arith.constant 0 : index
    %9 = vector.load %arg2[%c0_2, %c0_3] : memref<8x1xi32, #tpu.memory_space<vmem>>, vector<8x1xi32>
    %10 = tpu.iota {dimensions = array<i32: 1>} : vector<8x16xi32>
    %11 = vector.broadcast %9 : vector<8x1xi32> to vector<8x16xi32>
    %12 = arith.cmpi eq, %10, %11 : vector<8x16xi32>
    %cst_4 = arith.constant 0.000000e+00 : f32
    %13 = vector.broadcast %cst_4 : f32 to vector<8x16xf32>
    %14 = arith.select %12, %0, %13 : vector<8x16xi1>, vector<8x16xf32>
    %cst_5 = arith.constant dense<0.000000e+00> : vector<8xf32>
    %15 = vector.multi_reduction <add>, %14, %cst_5 [1] : vector<8x16xf32> to vector<8xf32>
    %16 = vector.shape_cast %15 : vector<8xf32> to vector<8x1xf32>
    %cst_6 = arith.constant dense<0.000000e+00> : vector<8xf32>
    %17 = vector.multi_reduction <add>, %0, %cst_6 [1] : vector<8x16xf32> to vector<8xf32>
    %18 = vector.shape_cast %17 : vector<8xf32> to vector<8x1xf32>
    %cst_7 = arith.constant 8.000000e-01 : f32
    %19 = vector.broadcast %cst_7 : f32 to vector<8x1xf32>
    %20 = arith.mulf %19, %16 : vector<8x1xf32>
    %cst_8 = arith.constant 1.250000e-02 : f32
    %21 = vector.broadcast %cst_8 : f32 to vector<8x1xf32>
    %22 = arith.mulf %21, %18 : vector<8x1xf32>
    %23 = arith.addf %20, %22 : vector<8x1xf32>
    %c1_i32 = arith.constant 1 : i32
    %24 = vector.broadcast %c1_i32 : i32 to vector<8x1xi32>
    %25 = arith.cmpi eq, %9, %24 : vector<8x1xi32>
    %26 = arith.select %25, %16, %23 : vector<8x1xi1>, vector<8x1xf32>
    %27 = arith.addf %2, %8 : vector<8x1xf32>
    %28 = arith.subf %27, %26 : vector<8x1xf32>
    %c8_i32 = arith.constant 8 : i32
    %29 = arith.muli %arg0, %c8_i32 : i32
    %30 = tpu.iota {dimensions = array<i32: 0>} : vector<8x1xi32>
    %31 = vector.broadcast %29 : i32 to vector<8x1xi32>
    %32 = arith.addi %31, %30 : vector<8x1xi32>
    %c8_i32_9 = arith.constant 8 : i32
    %33 = vector.broadcast %c8_i32_9 : i32 to vector<8x1xi32>
    %34 = arith.cmpi slt, %32, %33 : vector<8x1xi32>
    %cst_10 = arith.constant 0.000000e+00 : f32
    %35 = vector.broadcast %cst_10 : f32 to vector<8x1xf32>
    %36 = arith.select %34, %28, %35 : vector<8x1xi1>, vector<8x1xf32>
    %37 = vector.shape_cast %36 : vector<8x1xf32> to vector<1x8x1xf32>
    %cst_11 = arith.constant dense<0.000000e+00> : vector<1xf32>
    %38 = vector.multi_reduction <add>, %37, %cst_11 [1, 2] : vector<1x8x1xf32> to vector<1xf32>
    %39 = vector.shape_cast %38 : vector<1xf32> to vector<1x1x1xf32>
    %40 = vector.extract %39[0, 0, 0] : f32 from vector<1x1x1xf32>
    %41 = vector.broadcast %40 : f32 to vector<1x1x1xf32>
    %c0_12 = arith.constant 0 : index
    %c0_13 = arith.constant 0 : index
    %c0_14 = arith.constant 0 : index
    %42 = vector.load %arg3[%c0_12, %c0_13, %c0_14] : memref<1x1x1xf32, #tpu.memory_space<vmem>>, vector<1x1x1xf32>
    tpu.vector_store %arg3[%c0_12, %c0_13, %c0_14], %41 {strides = array<i32>} : memref<1x1x1xf32, #tpu.memory_space<vmem>>, vector<1x1x1xf32>,
    return
  }
  func.func @transform_0(%arg0: i32) -> (i32, i32) {
    %c0_i32 = arith.constant 0 : i32
    %c0_i32_0 = arith.constant 0 : i32
    return %arg0, %c0_i32 : i32, i32
  }
  func.func @transform_1(%arg0: i32) -> (i32, i32) {
    %c0_i32 = arith.constant 0 : i32
    %c0_i32_0 = arith.constant 0 : i32
    return %arg0, %c0_i32 : i32, i32
  }
  func.func @transform_2(%arg0: i32) -> (i32, i32, i32) {
    %c0_i32 = arith.constant 0 : i32
    %c0_i32_0 = arith.constant 0 : i32
    %c0_i32_1 = arith.constant 0 : i32
    return %arg0, %c0_i32, %c0_i32_0 : i32, i32, i32
  }
}

</mosaic_0001>

<bundles_post_ra>
// kernel: tpu_custom_call.1
= control target key start
LH: loop header
LB: loop body
LE: loop exit
PB: predicated region body
PF: predicated region fallthrough
CT: control target
= control target key end

     0   :  { %vm13_vm0 = vcmask 130048   ;;  %s142_s0 = inlined_call_operand.vmem [shape: f32[8,16], index: 0, kind: input, shape index: {}]   ;;  %s143_s1 = inlined_call_operand.vmem [shape: s32[8,1], index: 1, kind: input, shape index: {}]   ;;  %s144_s2 = inlined_call_operand.hbm [shape: f32[1,1,1], index: 2, kind: output, shape index: {}]  }
   0x1   :  { %v12_v0 = vld [vmem:[%s142_s0] sm:$0xff] }
   0x2   :  { %7 = vsyncpa [#allocation3], 0  ;;  %v14_v1 = vsel %vm13_vm0, %v12_v0, -inf  ;;  %v112_v2 = vmov 0   ;;  %v25_v3 = vld [vmem:[%s143_s1] sm:$0xff]  ;;  %v26_v7 = vlaneseq  ;;  %v36_v14 = vsel %vm13_vm0, %v12_v0, 0.0 }
   0x3   :  { %85 = vset.pattern.permute.xlu0 %v112_v2  ;;  %vm42_vm2 = vcmp.eq.s32.totalorder %v25_v3, 1  ;;  %vm53_vm3 = vcmask 7168   ;;  %s113_s0 = smov [#allocation2]   ;;  %vm65_vm4 = vcmask 0  }
   0x4   :  { %15 = vmax.xlane.f32.xlu0 %v14_v1  ;;  %v27_v8 = vand.u32 127, %v26_v7  ;;  %s73_s1 = sshll.u32 %s113_s0, 4  ;;  %s74_s1 = int_to_ptr.vmem [resolvable:$true] %s73_s1 }
   0x5   :  { %s90_s14 = scalar_lea.vmem %s74_s1, 16  ;;  %s94_s15 = scalar_lea.vmem %s74_s1, 32 }
   0x6   :  { %p91_p0 = scmp.ne.s32.totalorder %s74_s1, %s90_s14  ;;  %p95_p1 = scmp.lt.s32.totalorder %s74_s1, %s74_s1 }
   0x7   :  { %p96_p2 = scmp.lt.s32.totalorder %s94_s15, %s90_s14 }
   0x9   :  { %p97_p3 = por %p96_p2, %p95_p1 }
   0xb   :  { %p98_p4 = pnand %p97_p3, %p91_p0 }
  0x1a   :  { %29 = vperm.xlu0 %85, %v25_v3  }
  0x8d   :  { %v16_v4 = vpop.xlane.xlu0 %15 }
  0x8e   :  { %v17_v5 = vsub.f32 %v12_v0, %v16_v4 }
  0x90   :  { %v18_v6 = vmul.f32 1.442695, %v17_v5 }
  0x92   :  { %86 = vpow2.f32 %v18_v6 }
  0x95   :  { %v30_v9 = vpop.permute.xlu0 %29 }
  0x96   :  { %vm31_vm1 = vcmp.eq.s32.totalorder %v27_v8, %v30_v9 }
  0x97   :  { %v32_v11 = vsel %vm31_vm1, %v12_v0, 0.0 }
  0x98   :  { %v33_v13 = vsel %vm13_vm0, %v32_v11, 0.0 }
  0x9f   :  { %v87_v10 = vpop.eup %86 }
  0xa0   :  { %v20_v12 = vsel %vm13_vm0, %v87_v10, 0.0 }
  0xa1   :  { %21 = vadd.xlane.f32.xlu1 %v20_v12 }
  0xa5   :  { %34 = vadd.xlane.f32.xlu1 %v33_v13 }
  0xa9   :  { %37 = vadd.xlane.f32.xlu1 %v36_v14 }
 0x12a   :  { %v22_v15 = vpop.xlane.xlu1 %21 }
 0x12b   :  { %88 = vlog2.f32 %v22_v15 }
 0x12e   :  { %v35_v16 = vpop.xlane.xlu1 %34 }
 0x12f   :  { %v39_v18 = vmul.f32 0.8, %v35_v16 }
 0x132   :  { %v38_v17 = vpop.xlane.xlu1 %37 }
 0x133   :  { %v40_v19 = vmul.f32 0.0125, %v38_v17 }
 0x135   :  { %v41_v21 = vadd.f32 %v40_v19, %v39_v18 }
 0x137   :  { %v43_v24 = vsel %vm42_vm2, %v35_v16, %v41_v21 }
 0x138   :  { %v89_v20 = vpop.eup %88 }
 0x139   :  { %v24_v22 = vmul.f32 0.6931472, %v89_v20 }
 0x13b   :  { %v44_v23 = vadd.f32 %v24_v22, %v16_v4 }
 0x13d   :  { %v45_v25 = vsub.f32 %v44_v23, %v43_v24 }
 0x13f   :  { %v54_v26 = vsel %vm53_vm3, %v45_v25, 0.0 }
 0x140   :  { %55 = vadd.xlane.f32.xlu1 %v54_v26 }
 0x1c9   :  { %v56_v27 = vpop.xlane.xlu1 %55 }
 0x1ca   :  { %v57_v28 = vrot.slane %v56_v27, 4 }
 0x1cc   :  { %v58_v29 = vadd.f32 %v57_v28, %v56_v27 }
 0x1ce   :  { %v59_v30 = vrot.slane %v58_v29, 2 }
 0x1d0   :  { %v60_v31 = vadd.f32 %v59_v30, %v58_v29 }
 0x1d2   :  { %v61_v32 = vrot.slane %v60_v31, 1 }
 0x1d4   :  { %v62_v33 = vadd.f32 %v61_v32, %v60_v31 }
 0x1d6   :  { %81 = vpush %v62_v33 }
 0x207   :  { %s82_s13 = spop %81 }
 0x208   :  { %v64_v34 = vstv %s82_s13 }
 0x209   :  { %66 = vst.msk [vmem:[#allocation2] sm:$0x1] %vm65_vm4, %v64_v34 }
 0x20a   :  { %101 = shalt.err (!%p98_p4)
}
 0x20b   :  { %76 = dma.vmem_to_hbm [thread:$0]  %s74_s1, 16, %s144_s2, [#allocation3]  }
 0x20c   :  { %110 = dma.done.wait [#allocation3], 16  }
 0x20d   :  { %111 = vsyncadd [#allocation3], 4294967280 }
 0x20e   :  { %80 = vsyncpa [#allocation3], 1 }

</bundles_post_ra>
